<compile_context>
chip_gen: v7x
topology: tpu7x:2x2x1
jax: 0.10.0
libtpu: 0.0.40
codegen_flags: <defaults>
</compile_context>

<pallas_src>
import functools
import math

import jax
import jax.numpy as jnp
from jax import lax
from jax.experimental import pallas as pl
from jax.experimental.pallas import tpu as pltpu


def _layernorm_kernel(x_ref, alpha_ref, bias_ref, o_ref, *, eps, feat, groups):
    """x_ref/o_ref: (tile_rows, groups*feat); alpha_ref/bias_ref: (1, groups*feat)."""
    # All element-wise math in f32 (kernel is HBM-bound, the extra width is
    # free); the storage dtype is only touched at the final store.
    xf = x_ref[...].astype(jnp.float32)
    alpha = alpha_ref[...].astype(jnp.float32)
    bias = bias_ref[...].astype(jnp.float32)

    inv_n = 1.0 / feat
    # torch.std() default is the unbiased estimator (ddof=1).
    # TODO(synk): feat == 1 returns `bias` here while torch produces NaN
    # (std of a single sample with ddof=1); degenerate case left as-is.
    inv_ddof = 1.0 / max(feat - 1, 1)

    if groups == 1:
        # Two-pass variance: mean first, then sum of squared deviations (avoids
        # the catastrophic cancellation of E[x^2]-E[x]^2; the tile is already
        # resident in VMEM so the second pass costs no extra HBM traffic).
        mean = jnp.sum(xf, axis=-1, keepdims=True) * inv_n
        d = xf - mean
        var = jnp.sum(d * d, axis=-1, keepdims=True) * inv_ddof
        denom = jnp.sqrt(var) + eps
        inv = pl.reciprocal(denom, approx=True)      # EUP slot
        inv = inv * (2.0 - denom * inv)              # one Newton step -> ~f32 exact
        out = d * inv * alpha + bias
    else:
        width = groups * feat
        # Segment-sum / segment-broadcast via 0/1 selector matmuls on the MXU
        # (idle in this kernel); avoids sub-128-lane reshapes / relayouts.
        lane = lax.broadcasted_iota(jnp.int32, (width, groups), 0)
        grp = lax.broadcasted_iota(jnp.int32, (width, groups), 1)
        seg = ((lane >= grp * feat) & (lane < grp * feat + feat)).astype(jnp.float32)
        grp_r = lax.broadcasted_iota(jnp.int32, (groups, width), 0)
        lane_r = lax.broadcasted_iota(jnp.int32, (groups, width), 1)
        seg_t = ((lane_r >= grp_r * feat)
                 & (lane_r < grp_r * feat + feat)).astype(jnp.float32)

        s1 = jnp.dot(xf, seg, preferred_element_type=jnp.float32)        # (rows, groups)
        mean = s1 * inv_n
        mean_b = jnp.dot(mean, seg_t, preferred_element_type=jnp.float32)  # (rows, width)
        d = xf - mean_b
        ss = jnp.dot(d * d, seg, preferred_element_type=jnp.float32)
        denom = jnp.sqrt(ss * inv_ddof) + eps
        inv = pl.reciprocal(denom, approx=True)
        inv = inv * (2.0 - denom * inv)
        inv_b = jnp.dot(inv, seg_t, preferred_element_type=jnp.float32)
        out = d * inv_b * alpha + bias

    o_ref[...] = out.astype(o_ref.dtype)


def _vmem_budget_bytes():
    # ~3/4 of physical VMEM: ~96 MiB on v5e/v6e (128 MiB), ~48 MiB on v7x (64 MiB).
    cap = 64 * 1024 * 1024  # conservative fallback = v7x physical VMEM
    try:
        info = pltpu.get_tpu_info()
        cap = int(getattr(info, "vmem_capacity_bytes", 0)) or cap
    except Exception:
        pass
    return (cap * 3) // 4


def _pick_tile_rows(rows, width, itemsize, budget):
    """Bytes-targeted row tiling for a (rows, width) streaming kernel."""
    # Honest steady-state VMEM footprint per tile row: double-buffered input +
    # output blocks in the storage dtype, plus ~3 f32-wide compute temporaries
    # (widened x, centered x, product/output).  This makes the f32 widening of
    # bf16 inputs count against the budget instead of overflowing it (v7x).
    per_row = 2 * 2 * width * itemsize + 3 * width * 4
    # Target ~8 MiB input blocks: per-grid-step overhead (~0.35us) and DMA ramp
    # amortize to noise at multi-MiB blocks on v5e/v6e/v7x; the budget term
    # automatically shrinks this on v7x's 64 MiB VMEM.
    target_rows = max(1, (8 << 20) // max(width * itemsize, 1))
    vmem_rows = max(1, budget // per_row)
    tile = min(rows, target_rows, vmem_rows)
    if tile >= rows:
        return rows  # single block; a full second-to-last dim is always legal

    sublane = 16 if itemsize == 2 else (32 if itemsize == 1 else 8)
    # For large inputs keep >= 8 grid steps (each block >= ~1 MiB) so the
    # "parallel" row axis splits across v7x's two TensorCores with >= 4
    # pipelined steps per core; v5e/v6e (one core) are unaffected.
    min_split_rows = max(sublane, (1 << 20) // max(width * itemsize, 1))
    if rows >= 8 * min_split_rows:
        tile = min(tile, rows // 8)
    tile = max(sublane, (tile // sublane) * sublane)
    return int(tile)


def layer_normalization(x, alpha, bias, *, eps: float = 1e-6, tile_rows=None):
    """Pallas TPU implementation of the PyTorch LayerNormalization module."""
    orig_shape = x.shape
    feat = orig_shape[-1]
    rows = math.prod(orig_shape[:-1]) if len(orig_shape) > 1 else 1

    # Lane-dense repack for narrow feature dims: fold `groups` consecutive rows
    # into the 128-lane dim so output stores are unmasked vst (sub-128 last
    # dims otherwise force masked vst.msk on every output vreg).
    groups = 1
    if feat < 128:
        g = 128 // math.gcd(feat, 128)      # minimal k with k*feat % 128 == 0
        if g > 1 and rows % g == 0:
            groups = g
        # TODO(synk): when rows % g != 0 we fall back to the narrow
        # (masked-store) path instead of padding rows with an HBM round-trip.

    width = groups * feat
    packed_rows = rows // groups
    x2d = x.reshape(packed_rows, width)                      # contiguous: no HBM copy
    alpha2d = jnp.tile(jnp.asarray(alpha).reshape(1, feat), (1, groups))
    bias2d = jnp.tile(jnp.asarray(bias).reshape(1, feat), (1, groups))

    itemsize = jnp.dtype(x.dtype).itemsize
    budget = _vmem_budget_bytes()
    if tile_rows is None:
        tile_rows = _pick_tile_rows(packed_rows, width, itemsize, budget)

    # No HBM padding: grid = ceil(rows / tile); Pallas masks the ragged last block.
    grid = (pl.cdiv(packed_rows, tile_rows),)

    # VMEM limit from the same accounting used to pick the tile (double-buffered
    # in/out in storage dtype + f32 widening temporaries), with slack, capped at
    # the physical budget.
    block_bytes = tile_rows * width * itemsize
    needed = (2 * 2 * block_bytes
              + 3 * tile_rows * width * 4
              + 2 * width * 4
              + (2 << 20))
    vmem_limit = int(min(budget, max(2 * needed, 64 << 20)))

    out2d = pl.pallas_call(
        functools.partial(_layernorm_kernel, eps=eps, feat=feat, groups=groups),
        out_shape=jax.ShapeDtypeStruct((packed_rows, width), x.dtype),
        grid_spec=pltpu.PrefetchScalarGridSpec(
            num_scalar_prefetch=0,
            grid=grid,
            in_specs=[
                pl.BlockSpec((tile_rows, width), lambda i: (i, 0)),
                pl.BlockSpec((1, width), lambda i: (0, 0)),
                pl.BlockSpec((1, width), lambda i: (0, 0)),
            ],
            out_specs=pl.BlockSpec((tile_rows, width), lambda i: (i, 0)),
        ),
        compiler_params=pltpu.CompilerParams(
            dimension_semantics=("parallel",),
            vmem_limit_bytes=vmem_limit,
        ),
    )(x2d, alpha2d, bias2d)

    return out2d.reshape(orig_shape)


if __name__ == "__main__":
    key = jax.random.PRNGKey(0)
    batch, seq, hidden = 2, 8, 32

    x = jax.random.normal(key, (batch, seq, hidden), dtype=jnp.float32)
    # nn.Parameter(torch.ones(features)) for both alpha and bias
    alpha = jnp.ones((hidden,), dtype=jnp.float32)
    bias = jnp.ones((hidden,), dtype=jnp.float32)

    out = layer_normalization(x, alpha, bias, eps=1e-6)
    out = jax.block_until_ready(out)

    # Pure-JAX reference (unbiased std like torch.std default, eps added to std).
    mean = jnp.mean(x, axis=-1, keepdims=True)
    std = jnp.std(x, axis=-1, keepdims=True, ddof=1)
    ref = alpha * (x - mean) / (std + 1e-6) + bias
    assert jnp.allclose(out, ref, atol=1e-2, rtol=1e-2), "mismatch vs reference"

    print("KERNEL_OK")
</pallas_src>

<mosaic_0001>
module attributes {stable_mosaic.version = 11 : i64} {
  func.func @_layernorm_kernel(%arg0: i32, %arg1: memref<4x128xf32, #tpu.memory_space<vmem>>, %arg2: memref<1x128xf32, #tpu.memory_space<vmem>>, %arg3: memref<1x128xf32, #tpu.memory_space<vmem>>, %arg4: memref<4x128xf32, #tpu.memory_space<vmem>>) attributes {dimension_semantics = [#tpu.dimension_semantics<parallel>], iteration_bounds = array<i64: 1>, scalar_prefetch = 0 : i64, scratch_operands = 0 : i64, tpu.core_type = #tpu.core_type<tc>, window_params = [{transform_indices = @transform_0, window_bounds = array<i64: 4, 128>}, {pipeline_mode = #tpu.pipeline_mode<synchronous>, transform_indices = @transform_1, window_bounds = array<i64: 1, 128>}, {pipeline_mode = #tpu.pipeline_mode<synchronous>, transform_indices = @transform_2, window_bounds = array<i64: 1, 128>}, {transform_indices = @transform_3, window_bounds = array<i64: 4, 128>}]} {
    %c0 = arith.constant 0 : index
    %c0_0 = arith.constant 0 : index
    %0 = vector.load %arg1[%c0, %c0_0] : memref<4x128xf32, #tpu.memory_space<vmem>>, vector<4x128xf32>
    %c0_1 = arith.constant 0 : index
    %c0_2 = arith.constant 0 : index
    %1 = vector.load %arg2[%c0_1, %c0_2] : memref<1x128xf32, #tpu.memory_space<vmem>>, vector<1x128xf32>
    %c0_3 = arith.constant 0 : index
    %c0_4 = arith.constant 0 : index
    %2 = vector.load %arg3[%c0_3, %c0_4] : memref<1x128xf32, #tpu.memory_space<vmem>>, vector<1x128xf32>
    %3 = tpu.iota {dimensions = array<i32: 0>} : vector<128x4xi32>
    %4 = tpu.iota {dimensions = array<i32: 1>} : vector<128x4xi32>
    %c32_i32 = arith.constant 32 : i32
    %5 = vector.broadcast %c32_i32 : i32 to vector<128x4xi32>
    %6 = arith.muli %4, %5 : vector<128x4xi32>
    %7 = arith.cmpi sge, %3, %6 : vector<128x4xi32>
    %c32_i32_5 = arith.constant 32 : i32
    %8 = vector.broadcast %c32_i32_5 : i32 to vector<128x4xi32>
    %9 = arith.muli %4, %8 : vector<128x4xi32>
    %c32_i32_6 = arith.constant 32 : i32
    %10 = vector.broadcast %c32_i32_6 : i32 to vector<128x4xi32>
    %11 = arith.addi %9, %10 : vector<128x4xi32>
    %12 = arith.cmpi slt, %3, %11 : vector<128x4xi32>
    %13 = arith.andi %7, %12 : vector<128x4xi1>
    %14 = arith.extui %13 : vector<128x4xi1> to vector<128x4xi32>
    %15 = arith.sitofp %14 : vector<128x4xi32> to vector<128x4xf32>
    %16 = tpu.iota {dimensions = array<i32: 0>} : vector<4x128xi32>
    %17 = tpu.iota {dimensions = array<i32: 1>} : vector<4x128xi32>
    %c32_i32_7 = arith.constant 32 : i32
    %18 = vector.broadcast %c32_i32_7 : i32 to vector<4x128xi32>
    %19 = arith.muli %16, %18 : vector<4x128xi32>
    %20 = arith.cmpi sge, %17, %19 : vector<4x128xi32>
    %c32_i32_8 = arith.constant 32 : i32
    %21 = vector.broadcast %c32_i32_8 : i32 to vector<4x128xi32>
    %22 = arith.muli %16, %21 : vector<4x128xi32>
    %c32_i32_9 = arith.constant 32 : i32
    %23 = vector.broadcast %c32_i32_9 : i32 to vector<4x128xi32>
    %24 = arith.addi %22, %23 : vector<4x128xi32>
    %25 = arith.cmpi slt, %17, %24 : vector<4x128xi32>
    %26 = arith.andi %20, %25 : vector<4x128xi1>
    %27 = arith.extui %26 : vector<4x128xi1> to vector<4x128xi32>
    %28 = arith.sitofp %27 : vector<4x128xi32> to vector<4x128xf32>
    %cst = arith.constant dense<0.000000e+00> : vector<4x4xf32>
    %29 = tpu.matmul %0, %15, %cst {dimension_numbers = #tpu.dot_dimension_numbers<[1], [0], [0], [1], [0, 0, 1, 1], [], []>} : vector<4x128xf32>, vector<128x4xf32>, vector<4x4xf32> -> vector<4x4xf32>
    %cst_10 = arith.constant 3.125000e-02 : f32
    %30 = vector.broadcast %cst_10 : f32 to vector<4x4xf32>
    %31 = arith.mulf %29, %30 : vector<4x4xf32>
    %cst_11 = arith.constant dense<0.000000e+00> : vector<4x128xf32>
    %32 = tpu.matmul %31, %28, %cst_11 {dimension_numbers = #tpu.dot_dimension_numbers<[1], [0], [0], [1], [0, 0, 1, 1], [], []>} : vector<4x4xf32>, vector<4x128xf32>, vector<4x128xf32> -> vector<4x128xf32>
    %33 = arith.subf %0, %32 : vector<4x128xf32>
    %34 = arith.mulf %33, %33 : vector<4x128xf32>
    %cst_12 = arith.constant dense<0.000000e+00> : vector<4x4xf32>
    %35 = tpu.matmul %34, %15, %cst_12 {dimension_numbers = #tpu.dot_dimension_numbers<[1], [0], [0], [1], [0, 0, 1, 1], [], []>} : vector<4x128xf32>, vector<128x4xf32>, vector<4x4xf32> -> vector<4x4xf32>
    %cst_13 = arith.constant 0.0322580636 : f32
    %36 = vector.broadcast %cst_13 : f32 to vector<4x4xf32>
    %37 = arith.mulf %35, %36 : vector<4x4xf32>
    %38 = math.sqrt %37 : vector<4x4xf32>
    %cst_14 = arith.constant 9.99999997E-7 : f32
    %39 = vector.broadcast %cst_14 : f32 to vector<4x4xf32>
    %40 = arith.addf %38, %39 : vector<4x4xf32>
    %41 = tpu.reciprocal %40 {approx = true} : vector<4x4xf32> -> vector<4x4xf32>
    %42 = arith.mulf %40, %41 : vector<4x4xf32>
    %cst_15 = arith.constant 2.000000e+00 : f32
    %43 = vector.broadcast %cst_15 : f32 to vector<4x4xf32>
    %44 = arith.subf %43, %42 : vector<4x4xf32>
    %45 = arith.mulf %41, %44 : vector<4x4xf32>
    %cst_16 = arith.constant dense<0.000000e+00> : vector<4x128xf32>
    %46 = tpu.matmul %45, %28, %cst_16 {dimension_numbers = #tpu.dot_dimension_numbers<[1], [0], [0], [1], [0, 0, 1, 1], [], []>} : vector<4x4xf32>, vector<4x128xf32>, vector<4x128xf32> -> vector<4x128xf32>
    %47 = arith.mulf %33, %46 : vector<4x128xf32>
    %48 = vector.broadcast %1 : vector<1x128xf32> to vector<4x128xf32>
    %49 = arith.mulf %47, %48 : vector<4x128xf32>
    %50 = vector.broadcast %2 : vector<1x128xf32> to vector<4x128xf32>
    %51 = arith.addf %49, %50 : vector<4x128xf32>
    %c0_17 = arith.constant 0 : index
    %c0_18 = arith.constant 0 : index
    %52 = vector.load %arg4[%c0_17, %c0_18] : memref<4x128xf32, #tpu.memory_space<vmem>>, vector<4x128xf32>
    tpu.vector_store %arg4[%c0_17, %c0_18], %51 {strides = array<i32>} : memref<4x128xf32, #tpu.memory_space<vmem>>, vector<4x128xf32>,
    return
  }
  func.func @transform_0(%arg0: i32) -> (i32, i32) {
    %c0_i32 = arith.constant 0 : i32
    %c0_i32_0 = arith.constant 0 : i32
    return %arg0, %c0_i32 : i32, i32
  }
  func.func @transform_1(%arg0: i32) -> (i32, i32) {
    %c0_i32 = arith.constant 0 : i32
    %c0_i32_0 = arith.constant 0 : i32
    %c0_i32_1 = arith.constant 0 : i32
    return %c0_i32, %c0_i32_0 : i32, i32
  }
  func.func @transform_2(%arg0: i32) -> (i32, i32) {
    %c0_i32 = arith.constant 0 : i32
    %c0_i32_0 = arith.constant 0 : i32
    %c0_i32_1 = arith.constant 0 : i32
    return %c0_i32, %c0_i32_0 : i32, i32
  }
  func.func @transform_3(%arg0: i32) -> (i32, i32) {
    %c0_i32 = arith.constant 0 : i32
    %c0_i32_0 = arith.constant 0 : i32
    return %arg0, %c0_i32 : i32, i32
  }
}

</mosaic_0001>

<bundles_post_ra>
// kernel: tpu_custom_call.1
= control target key start
LH: loop header
LB: loop body
LE: loop exit
PB: predicated region body
PF: predicated region fallthrough
CT: control target
= control target key end

     0   :  { %8 = vsyncpa [#allocation3], 0  ;;  %s1094_s0 = inlined_call_operand.hbm [shape: f32[4,128], index: 0, kind: input, shape index: {}]   ;;  %s1095_s1 = inlined_call_operand.vmem [shape: f32[1,128], index: 1, kind: input, shape index: {}]   ;;  %s1096_s2 = inlined_call_operand.vmem [shape: f32[1,128], index: 2, kind: input, shape index: {}]   ;;  %s1097_s3 = inlined_call_operand.hbm [shape: f32[4,128], index: 3, kind: output, shape index: {}]  }
   0x1   :  { %9 = vsyncpa [#allocation4], 0  ;;  %s755_s12 = smov [#allocation2]   ;;  %s707_s16 = scalar_lea.hbm %s1094_s0, 64 }
   0x2   :  { %s16_s13 = sshll.u32 %s755_s12, 4  ;;  %p708_p0 = scmp.ne.s32.totalorder %s1094_s0, %s707_s16  ;;  %s17_s13 = int_to_ptr.vmem [resolvable:$true] %s16_s13 }
   0x3   :  { %p711_p1 = scmp.lt.u32.totalorder %s707_s16, %s1094_s0 }
   0x5   :  { %p713_p2 = pnand %p711_p1, %p708_p0 }
   0x7   :  { %716 = shalt.err (!%p713_p2)
}
   0x8   :  { %s717_s21 = scalar_lea.vmem %s17_s13, 64  ;;  %p722_p4 = scmp.lt.s32.totalorder %s17_s13, %s17_s13 }
   0x9   :  { %p718_p3 = scmp.ne.s32.totalorder %s17_s13, %s717_s21  ;;  %p723_p5 = scmp.lt.s32.totalorder %s717_s21, %s717_s21 }
   0xb   :  { %p724_p6 = por %p723_p5, %p722_p4 }
   0xd   :  { %p725_p7 = pnand %p724_p6, %p718_p3 }
   0xf   :  { %728 = shalt.err (!%p725_p7)
}
  0x10   :  { %19 = dma.hbm_to_vmem [thread:$0]  %s1094_s0, 64, %s17_s13, [#allocation3]   ;;  %v30_v0 = vlaneseq }
  0x11   :  { %751 = dma.done.wait [#allocation3], 64  }
  0x12   :  { %752 = vsyncadd [#allocation3], 4294967232  ;;  %v756_v1 = vmov 0.0|0.0   ;;  %v757_v2 = vmov 0.0   ;;  %v795_v3 = vshrl.u32 %v30_v0, 7  ;;  %v797_v4 = vand.u32 127, %v30_v0 }
  0x13   :  { %649 = vmatprep.subr.bf16.mxu0 %v756_v1  ;;  %604 = vmatprep.subr.mxu1 %v757_v2  ;;  %vm1100_vm0 = vmmov 0   ;;  %v1113_v11 = vmov 0  ;;  %v759_v15 = vmov 1.0|1.0   ;;  %v1117_v16 = vmov 0  ;;  %s760_s27 = smov [#allocation5]  }
  0x14   :  { %601 = vmatprep.mubr.msk.f32.mxu0 %vm1100_vm0, %v757_v2  ;;  %606 = vmatprep.mubr.msk.f32.mxu1 %vm1100_vm0, %v757_v2  ;;  %v32_v5 = vadd.s32 8, %v795_v3  ;;  %v805_v6 = vmul.u32 32, %v797_v4  ;;  %v33_v7 = vadd.s32 16, %v795_v3  ;;  %v34_v9 = vadd.s32 24, %v795_v3  ;;  %v27_v39 = vld [vmem:[#allocation2] sm:$0xf] }
  0x15   :  { %v35_v10 = vadd.s32 32, %v795_v3  ;;  %v36_v12 = vadd.s32 40, %v795_v3  ;;  %v37_v14 = vadd.s32 48, %v795_v3  ;;  %v38_v17 = vadd.s32 56, %v795_v3  ;;  %v529_v63 = vld [vmem:[%s1095_s1] ss:$0 sm:$0xff] }
  0x16   :  { %vm50_vm1 = vcmp.ge.s32.totalorder %v795_v3, %v805_v6  ;;  %v811_v8 = vadd.s32 32, %v805_v6  ;;  %vm51_vm2 = vcmp.ge.s32.totalorder %v32_v5, %v805_v6  ;;  %vm52_vm6 = vcmp.ge.s32.totalorder %v33_v7, %v805_v6  ;;  %s467_s28 = sshll.u32 %s760_s27, 4  ;;  %s468_s28 = int_to_ptr.vmem [resolvable:$true] %s467_s28 }
  0x17   :  { %vm53_vm9 = vcmp.ge.s32.totalorder %v34_v9, %v805_v6  ;;  %vm54_vm13 = vcmp.ge.s32.totalorder %v35_v10, %v805_v6  ;;  %v1119_v18 = vmov 0  ;;  %v39_v19 = vadd.s32 64, %v795_v3  ;;  %s729_s29 = scalar_lea.vmem %s468_s28, 64  ;;  %p734_p9 = scmp.lt.s32.totalorder %s468_s28, %s468_s28 }
  0x18   :  { %vm67_vm3 = vcmp.lt.s32.totalorder %v795_v3, %v811_v8  ;;  %vm68_vm4 = vcmp.lt.s32.totalorder %v32_v5, %v811_v8  ;;  %vm69_vm7 = vcmp.lt.s32.totalorder %v33_v7, %v811_v8  ;;  %vm70_vm10 = vcmp.lt.s32.totalorder %v34_v9, %v811_v8  ;;  %p730_p8 = scmp.ne.s32.totalorder %s468_s28, %s729_s29  ;;  %p735_p10 = scmp.lt.s32.totalorder %s729_s29, %s729_s29 }
  0x19   :  { %vm819_vm5 = vmand %vm50_vm1, %vm67_vm3  ;;  %vm71_vm14 = vcmp.lt.s32.totalorder %v35_v10, %v811_v8  ;;  %vm55_vm1 = vcmp.ge.s32.totalorder %v36_v12, %v805_v6  ;;  %v1121_v20 = vmov 0  ;;  %v40_v21 = vadd.s32 72, %v795_v3 }
  0x1a   :  { %v1114_v11 = vsel %vm819_vm5, 4294967295, %v1113_v11  ;;  %vm826_vm8 = vmand %vm51_vm2, %vm68_vm4  ;;  %vm72_vm2 = vcmp.lt.s32.totalorder %v36_v12, %v811_v8  ;;  %v1123_v22 = vmov 0  ;;  %v41_v23 = vadd.s32 80, %v795_v3  ;;  %p736_p11 = por %p735_p10, %p734_p9 }
  0x1b   :  { %vm1098_vm11 = vmpackc.low %vm826_vm8, %vm819_vm5  ;;  %v1125_v24 = vmov 0  ;;  %v42_v25 = vadd.s32 88, %v795_v3  ;;  %v1127_v26 = vmov 0  ;;  %vm59_vm0 = vcmp.ge.s32.totalorder %v40_v21, %v805_v6 }
  0x1c   :  { %651 = vmatpush3.bf16.msk.msra.mxu0 %vm1098_vm11, %v759_v15  ;;  %vm843_vm12 = vmand %vm52_vm6, %vm69_vm7  ;;  %vm56_vm6 = vcmp.ge.s32.totalorder %v37_v14, %v805_v6  ;;  %vm73_vm7 = vcmp.lt.s32.totalorder %v37_v14, %v811_v8  ;;  %v43_v28 = vadd.s32 96, %v795_v3  ;;  %v44_v30 = vadd.s32 104, %v795_v3  ;;  %p737_p12 = pnand %p736_p11, %p730_p8 }
  0x1d   :  { %v1118_v16 = vsel %vm843_vm12, 4294967295, %v1117_v16  ;;  %652 = vmatprep.subr.bf16.mxu0 %v756_v1  ;;  %vm851_vm15 = vmand %vm53_vm9, %vm70_vm10  ;;  %vm57_vm10 = vcmp.ge.s32.totalorder %v38_v17, %v805_v6  ;;  %v45_v33 = vadd.s32 112, %v795_v3  ;;  %v46_v34 = vadd.s32 120, %v795_v3 }
  0x1e   :  { %v1120_v18 = vsel %vm851_vm15, 4294967295, %v1119_v18  ;;  %vm1099_vm3 = vmpackc.low %vm851_vm15, %vm843_vm12  ;;  %vm77_vm12 = vcmp.lt.s32.totalorder %v41_v23, %v811_v8  ;;  %vm80_vm5 = vcmp.lt.s32.totalorder %v44_v30, %v811_v8  ;;  %v1145_v37 = vmov 0 }
  0x1f   :  { %vm862_vm4 = vmand %vm54_vm13, %vm71_vm14  ;;  %vm74_vm13 = vcmp.lt.s32.totalorder %v38_v17, %v811_v8  ;;  %vm76_vm14 = vcmp.lt.s32.totalorder %v40_v21, %v811_v8  ;;  %v131_v40 = vmul.u32 32, %v795_v3  ;;  %v530_v3 = vld [vmem:[%s1096_s2] ss:$0 sm:$0xff] }
  0x20   :  { %v1122_v20 = vsel %vm862_vm4, 4294967295, %v1121_v20  ;;  %654 = vmatpush3.bf16.msk.msra.mxu0 %vm1099_vm3, %v759_v15  ;;  %vm875_vm9 = vmand %vm55_vm1, %vm72_vm2  ;;  %vm58_vm1 = vcmp.ge.s32.totalorder %v39_v19, %v805_v6  ;;  %vm75_vm2 = vcmp.lt.s32.totalorder %v39_v19, %v811_v8 }
  0x21   :  { %v1124_v22 = vsel %vm875_vm9, 4294967295, %v1123_v22  ;;  %655 = vmatprep.subr.bf16.mxu0 %v756_v1  ;;  %vm887_vm11 = vmand %vm56_vm6, %vm73_vm7  ;;  %vm78_vm7 = vcmp.lt.s32.totalorder %v42_v25, %v811_v8  ;;  %v133_v41 = vadd.s32 32, %v131_v40 }
  0x22   :  { %v1126_v24 = vsel %vm887_vm11, 4294967295, %v1125_v24  ;;  %vm894_vm3 = vmand %vm57_vm10, %vm74_vm13  ;;  %vm60_vm13 = vcmp.ge.s32.totalorder %v41_v23, %v805_v6 }
  0x23   :  { %v1128_v26 = vsel %vm894_vm3, 4294967295, %v1127_v26  ;;  %vm1129_vm6 = vmpackc.low %vm875_vm9, %vm862_vm4  ;;  %vm62_vm4 = vcmp.ge.s32.totalorder %v43_v28, %v805_v6  ;;  %vm63_vm9 = vcmp.ge.s32.totalorder %v44_v30, %v805_v6 }
  0x24   :  { %657 = vmatpush3.bf16.msk.msra.mxu0 %vm1129_vm6, %v759_v15  ;;  %vm911_vm10 = vmand %vm58_vm1, %vm75_vm2  ;;  %vm61_vm6 = vcmp.ge.s32.totalorder %v42_v25, %v805_v6  ;;  %vm79_vm1 = vcmp.lt.s32.totalorder %v43_v28, %v811_v8 }
  0x25   :  { %658 = vmatprep.subr.bf16.mxu0 %v756_v1  ;;  %vm918_vm15 = vmand %vm59_vm0, %vm76_vm14 }
  0x26   :  { %vm1134_vm0 = vmpackc.low %vm894_vm3, %vm887_vm11  ;;  %vm65_vm11 = vcmp.ge.s32.totalorder %v46_v34, %v805_v6  ;;  %vm82_vm3 = vcmp.lt.s32.totalorder %v46_v34, %v811_v8 }
  0x27   :  { %vm935_vm14 = vmand %vm60_vm13, %vm77_vm12  ;;  %vm81_vm12 = vcmp.lt.s32.totalorder %v45_v33, %v811_v8 }
  0x28   :  { %660 = vmatpush3.bf16.msk.msra.mxu0 %vm1134_vm0, %v759_v15  ;;  %vm940_vm2 = vmand %vm61_vm6, %vm78_vm7  ;;  %vm64_vm0 = vcmp.ge.s32.totalorder %v45_v33, %v805_v6 }
  0x29   :  { %661 = vmatprep.subr.bf16.mxu0 %v756_v1  ;;  %vm1139_vm7 = vmpackc.low %vm918_vm15, %vm911_vm10 }
  0x2a   :  { %vm960_vm13 = vmand %vm62_vm4, %vm79_vm1 }
  0x2b   :  { %vm965_vm6 = vmand %vm63_vm9, %vm80_vm5 }
  0x2c   :  { %663 = vmatpush3.bf16.msk.msra.mxu0 %vm1139_vm7, %v759_v15  ;;  %vm1144_vm4 = vmpackc.low %vm940_vm2, %vm935_vm14  ;;  %vm134_vm7 = vcmp.lt.s32.totalorder %v797_v4, %v133_v41 }
  0x2d   :  { %664 = vmatprep.subr.bf16.mxu0 %v756_v1  ;;  %vm1110_vm5 = vmpackc.low %vm965_vm6, %vm960_vm13 }
  0x2e   :  { %vm984_vm9 = vmand %vm64_vm0, %vm81_vm12 }
  0x2f   :  { %v1146_v37 = vsel %vm984_vm9, 4294967295, %v1145_v37  ;;  %vm988_vm1 = vmand %vm65_vm11, %vm82_vm3  ;;  %vm1149_vm11 = vmmov 0   ;;  %vm132_vm3 = vcmp.ge.s32.totalorder %v797_v4, %v131_v40 }
  0x30   :  { %666 = vmatpush3.bf16.msk.msra.mxu0 %vm1144_vm4, %v759_v15  ;;  %vm1109_vm12 = vmpackc.low %vm988_vm1, %vm984_vm9  ;;  %vm213_vm4 = vcmask 1043456  }
  0x31   :  { %667 = vmatprep.subr.bf16.mxu0 %v756_v1  ;;  %vm135_vm0 = vmand %vm132_vm3, %vm134_vm7  ;;  %vm1152_vm3 = vnez %v1120_v18  ;;  %vm1153_vm7 = vnez %v1118_v16 }
  0x32   :  { %v492_v42 = vsel %vm135_vm0, 1.0, %v757_v2  ;;  %vm1154_vm0 = vmpackc.low %vm1152_vm3, %vm1153_vm7 }
  0x33   :  { %605 = vmatpush3.msk.msra.mxu1 %vm213_vm4, %v492_v42  ;;  %vm1161_vm3 = vmpackc.low %vm918_vm15, %vm911_vm10  ;;  %vm1164_vm15 = vnez %v1146_v37 }
  0x34   :  { %669 = vmatpush3.bf16.msk.msra.mxu0 %vm1110_vm5, %v759_v15  ;;  %673 = vmatprep.subr.bf16.mxu1 %v756_v1  ;;  %vm1150_vm5 = vnez %v1114_v11  ;;  %vm1162_vm7 = vmpackc.low %vm940_vm2, %vm935_vm14 }
  0x35   :  { %670 = vmatprep.subr.bf16.mxu0 %v756_v1  ;;  %vm1151_vm9 = vmpackc.low %vm826_vm8, %vm1150_vm5  ;;  %vm1156_vm8 = vnez %v1122_v20 }
  0x36   :  { %vm1165_vm10 = vmpackc.low %vm988_vm1, %vm1164_vm15 }
  0x38   :  { %672 = vmatpush3.bf16.msk.msra.mxu0 %vm1109_vm12, %v759_v15  ;;  %vm1112_vm12 = vcmask 31744  }
  0x39   :  { %644 = vmatprep.subr.mxu0 %v757_v2 }
  0x3b   :  { %602 = vmatmul.mubr.f32.vlgmr.msra.gmra.mrb[0].mxu0 %v27_v39 }
  0x3c   :  { %646 = vmatprep.mubr.msk.f32.mxu0 %vm1149_vm11, %v757_v2  ;;  %645 = vmatpush3.msk.msra.mxu0 %vm213_vm4, %v492_v42  ;;  %vm1155_vm4 = vnez %v1124_v22 }
  0x3d   :  { %vm1157_vm5 = vmpackc.low %vm1155_vm4, %vm1156_vm8 }
 0x10e   :  { %v204_v43 = vpop.f32.mrb[0].mxu0 }
 0x10f   :  { %v208_v44 = vmul.f32 0.03125, %v204_v43  ;;  %v603_v45 = vpop.f32.mrb[1].mxu0 }
 0x111   :  { %607 = vmatmul.mubr.msk.f32.vlgmr.msra.gmra.mrb[0].mxu1 %vm1112_vm12, %v208_v44 }
 0x112   :  { %675 = vmatpush3.bf16.msk.msra.mxu1 %vm1151_vm9, %v759_v15  ;;  %641 = vmatprep.mubr.msk.f32.mxu1 %vm1149_vm11, %v757_v2  ;;  %vm1158_vm9 = vnez %v1128_v26  ;;  %vm1159_vm11 = vnez %v1126_v24 }
 0x113   :  { %676 = vmatprep.subr.bf16.mxu1 %v756_v1  ;;  %vm1160_vm12 = vmpackc.low %vm1158_vm9, %vm1159_vm11 }
 0x116   :  { %678 = vmatpush3.bf16.msk.msra.mxu1 %vm1154_vm0, %v759_v15 }
 0x117   :  { %679 = vmatprep.subr.bf16.mxu1 %v756_v1 }
 0x11a   :  { %681 = vmatpush3.bf16.msk.msra.mxu1 %vm1157_vm5, %v759_v15 }
 0x11b   :  { %682 = vmatprep.subr.bf16.mxu1 %v756_v1 }
 0x11e   :  { %684 = vmatpush3.bf16.msk.msra.mxu1 %vm1160_vm12, %v759_v15  ;;  %vm1163_vm12 = vmpackc.low %vm965_vm6, %vm960_vm13  ;;  %vm1166_vm13 = vcmask 31744  }
 0x11f   :  { %685 = vmatprep.subr.bf16.mxu1 %v756_v1 }
 0x122   :  { %687 = vmatpush3.bf16.msk.msra.mxu1 %vm1161_vm3, %v759_v15 }
 0x123   :  { %688 = vmatprep.subr.bf16.mxu1 %v756_v1 }
 0x126   :  { %690 = vmatpush3.bf16.msk.msra.mxu1 %vm1162_vm7, %v759_v15 }
 0x127   :  { %691 = vmatprep.subr.bf16.mxu1 %v756_v1 }
 0x12a   :  { %693 = vmatpush3.bf16.msk.msra.mxu1 %vm1163_vm12, %v759_v15 }
 0x12b   :  { %694 = vmatprep.subr.bf16.mxu1 %v756_v1 }
 0x12e   :  { %696 = vmatpush3.bf16.msk.msra.mxu1 %vm1165_vm10, %v759_v15 }
 0x1e4   :  { %v283_v46 = vpop.f32.mrb[0].mxu1 }
 0x1e5   :  { %v287_v47 = vsub.f32 %v27_v39, %v283_v46  ;;  %v608_v48 = vpop.f32.mrb[1].mxu1 }
 0x1e7   :  { %v288_v49 = vmul.f32 %v287_v47, %v287_v47 }
 0x1e9   :  { %642 = vmatmul.mubr.f32.vlgmr.msra.gmra.mrb[2].mxu1 %v288_v49 }
 0x2bc   :  { %v355_v50 = vpop.f32.mrb[2].mxu1 }
 0x2bd   :  { %v359_v51 = vmul.f32 0.032258064, %v355_v50  ;;  %v643_v52 = vpop.f32.mrb[3].mxu1 }
 0x2bf   :  { %703 = vrsqrt.f32 %v359_v51  ;;  %vm362_vm14 = vcmp.eq.f32.partialorder %v359_v51, inf  ;;  %v365_v55 = vand.u32 2147483648, %v359_v51  ;;  %vm364_vm2 = vcmp.eq.f32.partialorder %v359_v51, 0.0 }
 0x2c9   :  { %v704_v53 = vpop.eup %703 }
 0x2ca   :  { %v361_v54 = vmul.f32 %v704_v53, %v359_v51 }
 0x2cc   :  { %v363_v56 = vsel %vm362_vm14, %v359_v51, %v361_v54 }
 0x2cd   :  { %v366_v57 = vsel %vm364_vm2, %v365_v55, %v363_v56 }
 0x2ce   :  { %v367_v58 = vadd.f32 1e-06, %v366_v57 }
 0x2d0   :  { %705 = vrcp.f32 %v367_v58 }
 0x2da   :  { %v706_v59 = vpop.eup %705 }
 0x2db   :  { %v369_v60 = vmul.f32 %v706_v59, %v367_v58 }
 0x2dd   :  { %v370_v61 = vsub.f32 2.0, %v369_v60 }
 0x2df   :  { %v371_v62 = vmul.f32 %v706_v59, %v370_v61 }
 0x2e1   :  { %647 = vmatmul.mubr.msk.f32.vlgmr.msra.gmra.mrb[2].mxu0 %vm1166_vm13, %v371_v62 }
 0x3b4   :  { %v441_v0 = vpop.f32.mrb[2].mxu0 }
 0x3b5   :  { %v445_v1 = vmul.f32 %v441_v0, %v287_v47  ;;  %v648_v2 = vpop.f32.mrb[3].mxu0 }
 0x3b7   :  { %v452_v4 = vmul.f32 %v529_v63, %v445_v1 }
 0x3b9   :  { %v459_v5 = vadd.f32 %v530_v3, %v452_v4 }
 0x3bb   :  { %460 = vst [vmem:[#allocation5] sm:$0xf] %v459_v5 }
 0x3bc   :  { %740 = shalt.err (!%p737_p12)
}
 0x3bd   :  { %s741_s4 = scalar_lea.hbm %s1097_s3, 64 }
 0x3be   :  { %p742_p13 = scmp.ne.s32.totalorder %s1097_s3, %s741_s4  ;;  %p745_p0 = scmp.lt.u32.totalorder %s741_s4, %s1097_s3 }
 0x3c0   :  { %p747_p1 = pnand %p745_p0, %p742_p13 }
 0x3c2   :  { %750 = shalt.err (!%p747_p1)
}
 0x3c3   :  { %470 = dma.vmem_to_hbm [thread:$0]  %s468_s28, 64, %s1097_s3, [#allocation4]  }
 0x3c4   :  { %753 = dma.done.wait [#allocation4], 64  }
 0x3c5   :  { %754 = vsyncadd [#allocation4], 4294967232 }
 0x3c6   :  { %474 = vsyncpa [#allocation3], 1 }
 0x3c7   :  { %475 = vsyncpa [#allocation4], 1 }

</bundles_post_ra>
